<compile_context>
chip_gen: v6e
topology: v6e:2x2x1
jax: 0.10.0
libtpu: 0.0.40
codegen_flags: <defaults>
</compile_context>

<pallas_src>
import functools

import jax
import jax.numpy as jnp
from jax.experimental import pallas as pl
from jax.experimental.pallas import tpu as pltpu


def _round_up(x, m):
    return (x + m - 1) // m * m


def _default_tiling():
    """Pick (max seq tile, vmem_limit_bytes) per TPU generation."""
    try:
        cap = pltpu.get_tpu_info().vmem_capacity_bytes
    except Exception:                      # conservative fallback (fits all gens)
        cap = 64 * 1024 * 1024
    if cap >= 100 * 1024 * 1024:           # v5e / v6e: 128 MiB physical VMEM
        return 512, 96 * 1024 * 1024
    return 256, 48 * 1024 * 1024           # v7x: 64 MiB physical VMEM


_DEFAULT_MAX_TILE, _DEFAULT_VMEM_LIMIT = _default_tiling()


def _flash_attention_kernel(q_ref, kt_ref, v_ref, wr_ref, o_ref,
                            acc_sc, m_sc, l_sc, *,
                            n_heads, t, n_k, seq_len, seq_pad, dx_p):
    """One (batch, q-tile, k-tile) grid step of the flash-attention core.

    q_ref  : (1, H, T, dq_h)  bf16  pre-projected, pre-scaled Q (head-major)
    kt_ref : (1, H, dq_h, T)  bf16  pre-projected, pre-transposed K
    v_ref  : (1, H, T, dv_h)  bf16  pre-projected V
    wr_ref : (H, dv_h, dx_p)  bf16  head-blocked output projection W_r
    o_ref  : (1, T, dx_p)           output tile (written on the last k step)
    acc_sc : (H, T, dv_h) f32       un-normalized attention output
    m_sc   : (H, T, 1)    f32       running row max
    l_sc   : (H, T, 1)    f32       running row sum
    """
    ki = pl.program_id(2)

    # ---- per-q-tile init of the online-softmax state ------------------------
    @pl.when(ki == 0)
    def _init():
        m_sc[...] = jnp.full_like(m_sc, -jnp.inf)
        l_sc[...] = jnp.zeros_like(l_sc)
        acc_sc[...] = jnp.zeros_like(acc_sc)

    def attn_step(masked):
        if masked:
            key_ids = ki * t + jax.lax.broadcasted_iota(jnp.int32, (1, t), 1)
            key_valid = key_ids < seq_len
        # Static loop over heads; head slices are leading-axis indexed so they
        # are layout-cheap.  For very large n_heads, switch to lax.fori_loop to
        # bound live ranges (v5e: single vector-store slot per bundle).
        for h in range(n_heads):
            s = jnp.dot(q_ref[0, h], kt_ref[0, h],
                        preferred_element_type=jnp.float32)        # (T, T) f32
            if masked:
                # Every k-tile holds >=1 real key (s_p - S < t), so a row can
                # never be fully masked (keeps l/acc well defined).
                s = jnp.where(key_valid, s, -1e30)
            m_prev = m_sc[h]
            m_new = jnp.maximum(m_prev, jnp.max(s, axis=-1, keepdims=True))
            alpha = jnp.exp(m_prev - m_new)
            p = jnp.exp(s - m_new)
            l_sc[h] = alpha * l_sc[h] + jnp.sum(p, axis=-1, keepdims=True)
            m_sc[h] = m_new
            acc_sc[h] = alpha * acc_sc[h] + jnp.dot(
                p.astype(jnp.bfloat16), v_ref[0, h],
                preferred_element_type=jnp.float32)

    if seq_pad > seq_len:
        # Padded keys only exist in the last k-tile: only that tile pays the
        # masking selects; all other tiles take the unmasked fast path.
        if n_k == 1:
            attn_step(True)
        else:
            @pl.when(ki == n_k - 1)
            def _masked():
                attn_step(True)

            @pl.when(ki < n_k - 1)
            def _unmasked():
                attn_step(False)
    else:
        attn_step(False)

    # ---- finalize: per-head normalize + fused output projection -------------
    @pl.when(ki == n_k - 1)
    def _finalize():
        out = jnp.zeros((t, dx_p), jnp.float32)
        for h in range(n_heads):
            inv_l = pl.reciprocal(l_sc[h], approx=True)             # (T, 1)
            r_h = (acc_sc[h] * inv_l).astype(jnp.bfloat16)          # (T, dv_h)
            out = out + jnp.dot(r_h, wr_ref[h],
                                preferred_element_type=jnp.float32)
        o_ref[0] = out.astype(o_ref.dtype)                          # lane-dense


@functools.partial(jax.jit,
                   static_argnames=("dimx", "dimq", "n_heads", "max_tile",
                                    "interpret"))
def self_attention(x, w_q, w_k, w_v, w_r, *, dimx, dimq, n_heads,
                   max_tile=None, interpret=False):
    """x: (B, S, dimx); weights have the PyTorch nn.Linear (out, in) shapes.

    Returns (B, S, dimx), matching SelfAttention.forward(X).
    """
    B, S, _ = x.shape
    if max_tile is None:
        max_tile = _DEFAULT_MAX_TILE

    t = min(max_tile, _round_up(S, 8))   # sequence tile (queries and keys)
    s_p = _round_up(S, t)                # padded sequence length
    n_q = s_p // t
    n_k = s_p // t
    dq_h = _round_up(dimq, 8)            # per-head query dim (no 128 padding)
    dv_h = _round_up(dimx, 8)            # per-head value dim (no 128 padding)
    dx_p = _round_up(dimx, 128)          # lane-dense output feature dim

    # ---- prologue (plain XLA): Q/K/V projections, computed ONCE -------------
    # Hoisted out of the kernel so they are no longer recomputed q_tiles times
    # per k-tile; K is produced pre-transposed so the kernel never transposes
    # an activation tile.  bf16 operands, f32 accumulation.
    xb = jnp.zeros((B, s_p, dimx), jnp.bfloat16).at[:, :S, :].set(
        x.astype(jnp.bfloat16))
    wq_h = jnp.asarray(w_q).reshape(n_heads, dimq, dimx).astype(jnp.bfloat16)
    wk_h = jnp.asarray(w_k).reshape(n_heads, dimq, dimx).astype(jnp.bfloat16)
    wv_h = jnp.asarray(w_v).reshape(n_heads, dimx, dimx).astype(jnp.bfloat16)
    wr_h = jnp.asarray(w_r).reshape(dimx, n_heads, dimx).astype(jnp.bfloat16)

    scale = 1.0 / (dimq ** 0.5)
    q = jnp.einsum("bsd,hed->bhse", xb, wq_h,
                   preferred_element_type=jnp.float32) * scale  # (B,H,s_p,dimq)
    kt = jnp.einsum("bsd,hed->bhes", xb, wk_h,
                    preferred_element_type=jnp.float32)         # (B,H,dimq,s_p)
    v = jnp.einsum("bsd,hed->bhse", xb, wv_h,
                   preferred_element_type=jnp.float32)          # (B,H,s_p,dimx)

    q_p = jnp.zeros((B, n_heads, s_p, dq_h), jnp.bfloat16
                    ).at[:, :, :, :dimq].set(q.astype(jnp.bfloat16))
    kt_p = jnp.zeros((B, n_heads, dq_h, s_p), jnp.bfloat16
                     ).at[:, :, :dimq, :].set(kt.astype(jnp.bfloat16))
    v_p = jnp.zeros((B, n_heads, s_p, dv_h), jnp.bfloat16
                    ).at[:, :, :, :dimx].set(v.astype(jnp.bfloat16))
    # W_r as (H, dv_h, dx_p): out[s, o] = sum_h r_h[s, :] @ wr_p[h, :, o]
    wr_p = jnp.zeros((n_heads, dv_h, dx_p), jnp.bfloat16
                     ).at[:, :dimx, :dimx].set(jnp.transpose(wr_h, (1, 2, 0)))

    kernel = functools.partial(
        _flash_attention_kernel, n_heads=n_heads, t=t, n_k=n_k,
        seq_len=S, seq_pad=s_p, dx_p=dx_p)

    grid = (B, n_q, n_k)

    out_p = pl.pallas_call(
        kernel,
        out_shape=jax.ShapeDtypeStruct((B, s_p, dx_p), x.dtype),
        grid_spec=pltpu.PrefetchScalarGridSpec(
            num_scalar_prefetch=0,
            grid=grid,
            in_specs=[
                pl.BlockSpec((1, n_heads, t, dq_h),
                             lambda b, qi, ki: (b, 0, qi, 0)),      # Q
                pl.BlockSpec((1, n_heads, dq_h, t),
                             lambda b, qi, ki: (b, 0, 0, ki)),      # K^T
                pl.BlockSpec((1, n_heads, t, dv_h),
                             lambda b, qi, ki: (b, 0, ki, 0)),      # V
                # Grid-invariant W_r.  (On v7x, pipeline_mode=pl.Buffered(1)
                # here would drop its second VMEM buffer.)
                pl.BlockSpec((n_heads, dv_h, dx_p),
                             lambda b, qi, ki: (0, 0, 0)),
            ],
            out_specs=pl.BlockSpec((1, t, dx_p), lambda b, qi, ki: (b, qi, 0)),
            scratch_shapes=[
                pltpu.VMEM((n_heads, t, dv_h), jnp.float32),   # acc
                pltpu.VMEM((n_heads, t, 1), jnp.float32),      # running max
                pltpu.VMEM((n_heads, t, 1), jnp.float32),      # running sum
            ]),
        compiler_params=pltpu.CompilerParams(
            dimension_semantics=("parallel", "parallel", "arbitrary"),
            vmem_limit_bytes=_DEFAULT_VMEM_LIMIT),
        interpret=interpret,
    )(q_p, kt_p, v_p, wr_p)

    return out_p[:, :S, :dimx]


def self_attention_reference(x, w_q, w_k, w_v, w_r, *, dimx, dimq, n_heads):
    """Pure-JAX transcription of the PyTorch forward, for verification."""
    Xt = jnp.swapaxes(x, 1, 2)                              # (B, dimx, S)
    B, _, S = Xt.shape
    Q = jnp.einsum('od,bds->bos', w_q, Xt)                  # (B, H*dimq, S)
    K = jnp.einsum('od,bds->bos', w_k, Xt)
    V = jnp.einsum('od,bds->bos', w_v, Xt)                  # (B, H*dimx, S)
    Q = Q.reshape(B, n_heads, dimq, S)
    K = K.reshape(B, n_heads, dimq, S)
    V = V.reshape(B, n_heads, dimx, S)
    scores = jnp.einsum('bhds,bhdt->bhst', Q, K) / (dimq ** 0.5)
    Z = jax.nn.softmax(scores, axis=3)                      # (B, H, S, S)
    R = jnp.einsum('bhdt,bhst->bhds', V, Z)                 # (B, H, dimx, S)
    R = R.reshape(B, n_heads * dimx, S)
    R = jnp.einsum('od,bds->bos', w_r, R)                   # (B, dimx, S)
    return jnp.swapaxes(R, 1, 2)                            # (B, S, dimx)


if __name__ == "__main__":
    # Small shapes consistent with the module's forward.
    B, S = 2, 8
    dimx, dimq, n_heads = 4, 4, 2

    key = jax.random.PRNGKey(0)
    kx, kq, kk, kv, kr = jax.random.split(key, 5)

    x = jax.random.normal(kx, (B, S, dimx), dtype=jnp.float32)
    # Deterministic synthetic parameters with nn.Linear weight shapes (out, in).
    w_q = jax.random.normal(kq, (dimq * n_heads, dimx), dtype=jnp.float32) * 0.5
    w_k = jax.random.normal(kk, (dimq * n_heads, dimx), dtype=jnp.float32) * 0.5
    w_v = jax.random.normal(kv, (dimx * n_heads, dimx), dtype=jnp.float32) * 0.5
    w_r = jax.random.normal(kr, (dimx, dimx * n_heads), dtype=jnp.float32) * 0.5

    # Reference on bf16-rounded inputs (the kernel feeds the MXU in bf16).
    def _rt(a):
        return a.astype(jnp.bfloat16).astype(jnp.float32)

    # --- test 1: single-tile path --------------------------------------------
    out = self_attention(x, w_q, w_k, w_v, w_r,
                         dimx=dimx, dimq=dimq, n_heads=n_heads)
    out = jax.block_until_ready(out)
    ref = self_attention_reference(_rt(x), _rt(w_q), _rt(w_k), _rt(w_v), _rt(w_r),
                                   dimx=dimx, dimq=dimq, n_heads=n_heads)
    ref = jax.block_until_ready(ref)
    assert out.shape == (B, S, dimx), out.shape
    err1 = float(jnp.max(jnp.abs(out - ref)))
    assert jnp.allclose(out, ref, atol=1e-1, rtol=1e-1), f"max abs err = {err1}"

    # --- test 2: multi-k-tile flash accumulation + padded-key masking --------
    S2 = 300
    x2 = jax.random.normal(kx, (B, S2, dimx), dtype=jnp.float32)
    out2 = self_attention(x2, w_q, w_k, w_v, w_r,
                          dimx=dimx, dimq=dimq, n_heads=n_heads, max_tile=128)
    out2 = jax.block_until_ready(out2)
    ref2 = self_attention_reference(_rt(x2), _rt(w_q), _rt(w_k), _rt(w_v),
                                    _rt(w_r), dimx=dimx, dimq=dimq,
                                    n_heads=n_heads)
    ref2 = jax.block_until_ready(ref2)
    assert out2.shape == (B, S2, dimx), out2.shape
    err2 = float(jnp.max(jnp.abs(out2 - ref2)))
    assert jnp.allclose(out2, ref2, atol=1e-1, rtol=1e-1), f"max abs err = {err2}"

    print("KERNEL_OK")
</pallas_src>

<mosaic_0001>
module attributes {stable_mosaic.version = 11 : i64} {
  func.func @_flash_attention_kernel(%arg0: i32, %arg1: i32, %arg2: i32, %arg3: memref<1x2x8x8xbf16, #tpu.memory_space<vmem>>, %arg4: memref<1x2x8x8xbf16, #tpu.memory_space<vmem>>, %arg5: memref<1x2x8x8xbf16, #tpu.memory_space<vmem>>, %arg6: memref<2x8x128xbf16, #tpu.memory_space<vmem>>, %arg7: memref<1x8x128xf32, #tpu.memory_space<vmem>>, %arg8: memref<2x8x8xf32, #tpu.memory_space<vmem>>, %arg9: memref<2x8x1xf32, #tpu.memory_space<vmem>>, %arg10: memref<2x8x1xf32, #tpu.memory_space<vmem>>) attributes {dimension_semantics = [#tpu.dimension_semantics<parallel>, #tpu.dimension_semantics<parallel>, #tpu.dimension_semantics<arbitrary>], iteration_bounds = array<i64: 2, 1, 1>, scalar_prefetch = 0 : i64, scratch_operands = 3 : i64, tpu.core_type = #tpu.core_type<tc>, window_params = [{transform_indices = @transform_0, window_bounds = array<i64: 1, 2, 8, 8>}, {transform_indices = @transform_1, window_bounds = array<i64: 1, 2, 8, 8>}, {transform_indices = @transform_2, window_bounds = array<i64: 1, 2, 8, 8>}, {pipeline_mode = #tpu.pipeline_mode<synchronous>, transform_indices = @transform_3, window_bounds = array<i64: 2, 8, 128>}, {transform_indices = @transform_4, window_bounds = array<i64: 1, 8, 128>}]} {
    %c0_i32 = arith.constant 0 : i32
    %0 = arith.cmpi eq, %arg2, %c0_i32 : i32
    %1 = arith.extui %0 : i1 to i32
    %c0_i32_0 = arith.constant 0 : i32
    %2 = arith.cmpi ne, %1, %c0_i32_0 : i32
    scf.if %2 {
      %cst_68 = arith.constant 0xFF800000 : f32
      %84 = vector.broadcast %cst_68 : f32 to vector<2x8x1xf32>
      %c0_69 = arith.constant 0 : index
      %c0_70 = arith.constant 0 : index
      %c0_71 = arith.constant 0 : index
      %85 = vector.load %arg9[%c0_69, %c0_70, %c0_71] : memref<2x8x1xf32, #tpu.memory_space<vmem>>, vector<2x8x1xf32>
      tpu.vector_store %arg9[%c0_69, %c0_70, %c0_71], %84 {strides = array<i32>} : memref<2x8x1xf32, #tpu.memory_space<vmem>>, vector<2x8x1xf32>,
      %cst_72 = arith.constant 0.000000e+00 : f32
      %86 = vector.broadcast %cst_72 : f32 to vector<2x8x1xf32>
      %c0_73 = arith.constant 0 : index
      %c0_74 = arith.constant 0 : index
      %c0_75 = arith.constant 0 : index
      %87 = vector.load %arg10[%c0_73, %c0_74, %c0_75] : memref<2x8x1xf32, #tpu.memory_space<vmem>>, vector<2x8x1xf32>
      tpu.vector_store %arg10[%c0_73, %c0_74, %c0_75], %86 {strides = array<i32>} : memref<2x8x1xf32, #tpu.memory_space<vmem>>, vector<2x8x1xf32>,
      %cst_76 = arith.constant 0.000000e+00 : f32
      %88 = vector.broadcast %cst_76 : f32 to vector<2x8x8xf32>
      %c0_77 = arith.constant 0 : index
      %c0_78 = arith.constant 0 : index
      %c0_79 = arith.constant 0 : index
      %89 = vector.load %arg8[%c0_77, %c0_78, %c0_79] : memref<2x8x8xf32, #tpu.memory_space<vmem>>, vector<2x8x8xf32>
      tpu.vector_store %arg8[%c0_77, %c0_78, %c0_79], %88 {strides = array<i32>} : memref<2x8x8xf32, #tpu.memory_space<vmem>>, vector<2x8x8xf32>,
    } else {
    }
    %c0 = arith.constant 0 : index
    %c0_1 = arith.constant 0 : index
    %c0_2 = arith.constant 0 : index
    %c0_3 = arith.constant 0 : index
    %3 = vector.load %arg3[%c0, %c0_1, %c0_2, %c0_3] : memref<1x2x8x8xbf16, #tpu.memory_space<vmem>>, vector<1x1x8x8xbf16>
    %4 = vector.shape_cast %3 : vector<1x1x8x8xbf16> to vector<8x8xbf16>
    %c0_4 = arith.constant 0 : index
    %c0_5 = arith.constant 0 : index
    %c0_6 = arith.constant 0 : index
    %c0_7 = arith.constant 0 : index
    %5 = vector.load %arg4[%c0_4, %c0_5, %c0_6, %c0_7] : memref<1x2x8x8xbf16, #tpu.memory_space<vmem>>, vector<1x1x8x8xbf16>
    %6 = vector.shape_cast %5 : vector<1x1x8x8xbf16> to vector<8x8xbf16>
    %cst = arith.constant dense<0.000000e+00> : vector<8x8xf32>
    %7 = tpu.matmul %4, %6, %cst {dimension_numbers = #tpu.dot_dimension_numbers<[1], [0], [0], [1], [0, 0, 1, 1], [], []>} : vector<8x8xbf16>, vector<8x8xbf16>, vector<8x8xf32> -> vector<8x8xf32>
    %c0_8 = arith.constant 0 : index
    %c0_9 = arith.constant 0 : index
    %c0_10 = arith.constant 0 : index
    %8 = vector.load %arg9[%c0_8, %c0_9, %c0_10] : memref<2x8x1xf32, #tpu.memory_space<vmem>>, vector<1x8x1xf32>
    %9 = vector.shape_cast %8 : vector<1x8x1xf32> to vector<8x1xf32>
    %cst_11 = arith.constant dense<0xFF800000> : vector<8xf32>
    %10 = vector.multi_reduction <maximumf>, %7, %cst_11 [1] : vector<8x8xf32> to vector<8xf32>
    %11 = vector.shape_cast %10 : vector<8xf32> to vector<8x1xf32>
    %12 = arith.maximumf %9, %11 : vector<8x1xf32>
    %13 = arith.subf %9, %12 : vector<8x1xf32>
    %14 = math.exp %13 : vector<8x1xf32>
    %15 = vector.broadcast %12 : vector<8x1xf32> to vector<8x8xf32>
    %16 = arith.subf %7, %15 : vector<8x8xf32>
    %17 = math.exp %16 : vector<8x8xf32>
    %c0_12 = arith.constant 0 : index
    %c0_13 = arith.constant 0 : index
    %c0_14 = arith.constant 0 : index
    %18 = vector.load %arg10[%c0_12, %c0_13, %c0_14] : memref<2x8x1xf32, #tpu.memory_space<vmem>>, vector<1x8x1xf32>
    %19 = vector.shape_cast %18 : vector<1x8x1xf32> to vector<8x1xf32>
    %20 = arith.mulf %14, %19 : vector<8x1xf32>
    %cst_15 = arith.constant dense<0.000000e+00> : vector<8xf32>
    %21 = vector.multi_reduction <add>, %17, %cst_15 [1] : vector<8x8xf32> to vector<8xf32>
    %22 = vector.shape_cast %21 : vector<8xf32> to vector<8x1xf32>
    %23 = arith.addf %20, %22 : vector<8x1xf32>
    %c0_16 = arith.constant 0 : index
    %c0_17 = arith.constant 0 : index
    %c0_18 = arith.constant 0 : index
    %24 = vector.load %arg10[%c0_16, %c0_17, %c0_18] : memref<2x8x1xf32, #tpu.memory_space<vmem>>, vector<1x8x1xf32>
    %25 = vector.shape_cast %24 : vector<1x8x1xf32> to vector<8x1xf32>
    %26 = vector.shape_cast %23 : vector<8x1xf32> to vector<1x8x1xf32>
    tpu.vector_store %arg10[%c0_16, %c0_17, %c0_18], %26 {strides = array<i32>} : memref<2x8x1xf32, #tpu.memory_space<vmem>>, vector<1x8x1xf32>,
    %c0_19 = arith.constant 0 : index
    %c0_20 = arith.constant 0 : index
    %c0_21 = arith.constant 0 : index
    %27 = vector.load %arg9[%c0_19, %c0_20, %c0_21] : memref<2x8x1xf32, #tpu.memory_space<vmem>>, vector<1x8x1xf32>
    %28 = vector.shape_cast %27 : vector<1x8x1xf32> to vector<8x1xf32>
    %29 = vector.shape_cast %12 : vector<8x1xf32> to vector<1x8x1xf32>
    tpu.vector_store %arg9[%c0_19, %c0_20, %c0_21], %29 {strides = array<i32>} : memref<2x8x1xf32, #tpu.memory_space<vmem>>, vector<1x8x1xf32>,
    %c0_22 = arith.constant 0 : index
    %c0_23 = arith.constant 0 : index
    %c0_24 = arith.constant 0 : index
    %30 = vector.load %arg8[%c0_22, %c0_23, %c0_24] : memref<2x8x8xf32, #tpu.memory_space<vmem>>, vector<1x8x8xf32>
    %31 = vector.shape_cast %30 : vector<1x8x8xf32> to vector<8x8xf32>
    %32 = vector.broadcast %14 : vector<8x1xf32> to vector<8x8xf32>
    %33 = arith.mulf %32, %31 : vector<8x8xf32>
    %34 = arith.truncf %17 : vector<8x8xf32> to vector<8x8xbf16>
    %c0_25 = arith.constant 0 : index
    %c0_26 = arith.constant 0 : index
    %c0_27 = arith.constant 0 : index
    %c0_28 = arith.constant 0 : index
    %35 = vector.load %arg5[%c0_25, %c0_26, %c0_27, %c0_28] : memref<1x2x8x8xbf16, #tpu.memory_space<vmem>>, vector<1x1x8x8xbf16>
    %36 = vector.shape_cast %35 : vector<1x1x8x8xbf16> to vector<8x8xbf16>
    %cst_29 = arith.constant dense<0.000000e+00> : vector<8x8xf32>
    %37 = tpu.matmul %34, %36, %cst_29 {dimension_numbers = #tpu.dot_dimension_numbers<[1], [0], [0], [1], [0, 0, 1, 1], [], []>} : vector<8x8xbf16>, vector<8x8xbf16>, vector<8x8xf32> -> vector<8x8xf32>
    %38 = arith.addf %33, %37 : vector<8x8xf32>
    %c0_30 = arith.constant 0 : index
    %c0_31 = arith.constant 0 : index
    %c0_32 = arith.constant 0 : index
    %39 = vector.load %arg8[%c0_30, %c0_31, %c0_32] : memref<2x8x8xf32, #tpu.memory_space<vmem>>, vector<1x8x8xf32>
    %40 = vector.shape_cast %39 : vector<1x8x8xf32> to vector<8x8xf32>
    %41 = vector.shape_cast %38 : vector<8x8xf32> to vector<1x8x8xf32>
    tpu.vector_store %arg8[%c0_30, %c0_31, %c0_32], %41 {strides = array<i32>} : memref<2x8x8xf32, #tpu.memory_space<vmem>>, vector<1x8x8xf32>,
    %c0_33 = arith.constant 0 : index
    %c1 = arith.constant 1 : index
    %c0_34 = arith.constant 0 : index
    %c0_35 = arith.constant 0 : index
    %42 = vector.load %arg3[%c0_33, %c1, %c0_34, %c0_35] : memref<1x2x8x8xbf16, #tpu.memory_space<vmem>>, vector<1x1x8x8xbf16>
    %43 = vector.shape_cast %42 : vector<1x1x8x8xbf16> to vector<8x8xbf16>
    %c0_36 = arith.constant 0 : index
    %c1_37 = arith.constant 1 : index
    %c0_38 = arith.constant 0 : index
    %c0_39 = arith.constant 0 : index
    %44 = vector.load %arg4[%c0_36, %c1_37, %c0_38, %c0_39] : memref<1x2x8x8xbf16, #tpu.memory_space<vmem>>, vector<1x1x8x8xbf16>
    %45 = vector.shape_cast %44 : vector<1x1x8x8xbf16> to vector<8x8xbf16>
    %cst_40 = arith.constant dense<0.000000e+00> : vector<8x8xf32>
    %46 = tpu.matmul %43, %45, %cst_40 {dimension_numbers = #tpu.dot_dimension_numbers<[1], [0], [0], [1], [0, 0, 1, 1], [], []>} : vector<8x8xbf16>, vector<8x8xbf16>, vector<8x8xf32> -> vector<8x8xf32>
    %c1_41 = arith.constant 1 : index
    %c0_42 = arith.constant 0 : index
    %c0_43 = arith.constant 0 : index
    %47 = vector.load %arg9[%c1_41, %c0_42, %c0_43] : memref<2x8x1xf32, #tpu.memory_space<vmem>>, vector<1x8x1xf32>
    %48 = vector.shape_cast %47 : vector<1x8x1xf32> to vector<8x1xf32>
    %cst_44 = arith.constant dense<0xFF800000> : vector<8xf32>
    %49 = vector.multi_reduction <maximumf>, %46, %cst_44 [1] : vector<8x8xf32> to vector<8xf32>
    %50 = vector.shape_cast %49 : vector<8xf32> to vector<8x1xf32>
    %51 = arith.maximumf %48, %50 : vector<8x1xf32>
    %52 = arith.subf %48, %51 : vector<8x1xf32>
    %53 = math.exp %52 : vector<8x1xf32>
    %54 = vector.broadcast %51 : vector<8x1xf32> to vector<8x8xf32>
    %55 = arith.subf %46, %54 : vector<8x8xf32>
    %56 = math.exp %55 : vector<8x8xf32>
    %c1_45 = arith.constant 1 : index
    %c0_46 = arith.constant 0 : index
    %c0_47 = arith.constant 0 : index
    %57 = vector.load %arg10[%c1_45, %c0_46, %c0_47] : memref<2x8x1xf32, #tpu.memory_space<vmem>>, vector<1x8x1xf32>
    %58 = vector.shape_cast %57 : vector<1x8x1xf32> to vector<8x1xf32>
    %59 = arith.mulf %53, %58 : vector<8x1xf32>
    %cst_48 = arith.constant dense<0.000000e+00> : vector<8xf32>
    %60 = vector.multi_reduction <add>, %56, %cst_48 [1] : vector<8x8xf32> to vector<8xf32>
    %61 = vector.shape_cast %60 : vector<8xf32> to vector<8x1xf32>
    %62 = arith.addf %59, %61 : vector<8x1xf32>
    %c1_49 = arith.constant 1 : index
    %c0_50 = arith.constant 0 : index
    %c0_51 = arith.constant 0 : index
    %63 = vector.load %arg10[%c1_49, %c0_50, %c0_51] : memref<2x8x1xf32, #tpu.memory_space<vmem>>, vector<1x8x1xf32>
    %64 = vector.shape_cast %63 : vector<1x8x1xf32> to vector<8x1xf32>
    %65 = vector.shape_cast %62 : vector<8x1xf32> to vector<1x8x1xf32>
    tpu.vector_store %arg10[%c1_49, %c0_50, %c0_51], %65 {strides = array<i32>} : memref<2x8x1xf32, #tpu.memory_space<vmem>>, vector<1x8x1xf32>,
    %c1_52 = arith.constant 1 : index
    %c0_53 = arith.constant 0 : index
    %c0_54 = arith.constant 0 : index
    %66 = vector.load %arg9[%c1_52, %c0_53, %c0_54] : memref<2x8x1xf32, #tpu.memory_space<vmem>>, vector<1x8x1xf32>
    %67 = vector.shape_cast %66 : vector<1x8x1xf32> to vector<8x1xf32>
    %68 = vector.shape_cast %51 : vector<8x1xf32> to vector<1x8x1xf32>
    tpu.vector_store %arg9[%c1_52, %c0_53, %c0_54], %68 {strides = array<i32>} : memref<2x8x1xf32, #tpu.memory_space<vmem>>, vector<1x8x1xf32>,
    %c1_55 = arith.constant 1 : index
    %c0_56 = arith.constant 0 : index
    %c0_57 = arith.constant 0 : index
    %69 = vector.load %arg8[%c1_55, %c0_56, %c0_57] : memref<2x8x8xf32, #tpu.memory_space<vmem>>, vector<1x8x8xf32>
    %70 = vector.shape_cast %69 : vector<1x8x8xf32> to vector<8x8xf32>
    %71 = vector.broadcast %53 : vector<8x1xf32> to vector<8x8xf32>
    %72 = arith.mulf %71, %70 : vector<8x8xf32>
    %73 = arith.truncf %56 : vector<8x8xf32> to vector<8x8xbf16>
    %c0_58 = arith.constant 0 : index
    %c1_59 = arith.constant 1 : index
    %c0_60 = arith.constant 0 : index
    %c0_61 = arith.constant 0 : index
    %74 = vector.load %arg5[%c0_58, %c1_59, %c0_60, %c0_61] : memref<1x2x8x8xbf16, #tpu.memory_space<vmem>>, vector<1x1x8x8xbf16>
    %75 = vector.shape_cast %74 : vector<1x1x8x8xbf16> to vector<8x8xbf16>
    %cst_62 = arith.constant dense<0.000000e+00> : vector<8x8xf32>
    %76 = tpu.matmul %73, %75, %cst_62 {dimension_numbers = #tpu.dot_dimension_numbers<[1], [0], [0], [1], [0, 0, 1, 1], [], []>} : vector<8x8xbf16>, vector<8x8xbf16>, vector<8x8xf32> -> vector<8x8xf32>
    %77 = arith.addf %72, %76 : vector<8x8xf32>
    %c1_63 = arith.constant 1 : index
    %c0_64 = arith.constant 0 : index
    %c0_65 = arith.constant 0 : index
    %78 = vector.load %arg8[%c1_63, %c0_64, %c0_65] : memref<2x8x8xf32, #tpu.memory_space<vmem>>, vector<1x8x8xf32>
    %79 = vector.shape_cast %78 : vector<1x8x8xf32> to vector<8x8xf32>
    %80 = vector.shape_cast %77 : vector<8x8xf32> to vector<1x8x8xf32>
    tpu.vector_store %arg8[%c1_63, %c0_64, %c0_65], %80 {strides = array<i32>} : memref<2x8x8xf32, #tpu.memory_space<vmem>>, vector<1x8x8xf32>,
    %c0_i32_66 = arith.constant 0 : i32
    %81 = arith.cmpi eq, %arg2, %c0_i32_66 : i32
    %82 = arith.extui %81 : i1 to i32
    %c0_i32_67 = arith.constant 0 : i32
    %83 = arith.cmpi ne, %82, %c0_i32_67 : i32
    scf.if %83 {
      %cst_68 = arith.constant 0.000000e+00 : f32
      %84 = vector.broadcast %cst_68 : f32 to vector<8x128xf32>
      %c0_69 = arith.constant 0 : index
      %c0_70 = arith.constant 0 : index
      %c0_71 = arith.constant 0 : index
      %85 = vector.load %arg10[%c0_69, %c0_70, %c0_71] : memref<2x8x1xf32, #tpu.memory_space<vmem>>, vector<1x8x1xf32>
      %86 = vector.shape_cast %85 : vector<1x8x1xf32> to vector<8x1xf32>
      %87 = tpu.reciprocal %86 {approx = true} : vector<8x1xf32> -> vector<8x1xf32>
      %c0_72 = arith.constant 0 : index
      %c0_73 = arith.constant 0 : index
      %c0_74 = arith.constant 0 : index
      %88 = vector.load %arg8[%c0_72, %c0_73, %c0_74] : memref<2x8x8xf32, #tpu.memory_space<vmem>>, vector<1x8x8xf32>
      %89 = vector.shape_cast %88 : vector<1x8x8xf32> to vector<8x8xf32>
      %90 = vector.broadcast %87 : vector<8x1xf32> to vector<8x8xf32>
      %91 = arith.mulf %89, %90 : vector<8x8xf32>
      %92 = arith.truncf %91 : vector<8x8xf32> to vector<8x8xbf16>
      %c0_75 = arith.constant 0 : index
      %c0_76 = arith.constant 0 : index
      %c0_77 = arith.constant 0 : index
      %93 = vector.load %arg6[%c0_75, %c0_76, %c0_77] : memref<2x8x128xbf16, #tpu.memory_space<vmem>>, vector<1x8x128xbf16>
      %94 = vector.shape_cast %93 : vector<1x8x128xbf16> to vector<8x128xbf16>
      %cst_78 = arith.constant dense<0.000000e+00> : vector<8x128xf32>
      %95 = tpu.matmul %92, %94, %cst_78 {dimension_numbers = #tpu.dot_dimension_numbers<[1], [0], [0], [1], [0, 0, 1, 1], [], []>} : vector<8x8xbf16>, vector<8x128xbf16>, vector<8x128xf32> -> vector<8x128xf32>
      %96 = arith.addf %84, %95 : vector<8x128xf32>
      %c1_79 = arith.constant 1 : index
      %c0_80 = arith.constant 0 : index
      %c0_81 = arith.constant 0 : index
      %97 = vector.load %arg10[%c1_79, %c0_80, %c0_81] : memref<2x8x1xf32, #tpu.memory_space<vmem>>, vector<1x8x1xf32>
      %98 = vector.shape_cast %97 : vector<1x8x1xf32> to vector<8x1xf32>
      %99 = tpu.reciprocal %98 {approx = true} : vector<8x1xf32> -> vector<8x1xf32>
      %c1_82 = arith.constant 1 : index
      %c0_83 = arith.constant 0 : index
      %c0_84 = arith.constant 0 : index
      %100 = vector.load %arg8[%c1_82, %c0_83, %c0_84] : memref<2x8x8xf32, #tpu.memory_space<vmem>>, vector<1x8x8xf32>
      %101 = vector.shape_cast %100 : vector<1x8x8xf32> to vector<8x8xf32>
      %102 = vector.broadcast %99 : vector<8x1xf32> to vector<8x8xf32>
      %103 = arith.mulf %101, %102 : vector<8x8xf32>
      %104 = arith.truncf %103 : vector<8x8xf32> to vector<8x8xbf16>
      %c1_85 = arith.constant 1 : index
      %c0_86 = arith.constant 0 : index
      %c0_87 = arith.constant 0 : index
      %105 = vector.load %arg6[%c1_85, %c0_86, %c0_87] : memref<2x8x128xbf16, #tpu.memory_space<vmem>>, vector<1x8x128xbf16>
      %106 = vector.shape_cast %105 : vector<1x8x128xbf16> to vector<8x128xbf16>
      %cst_88 = arith.constant dense<0.000000e+00> : vector<8x128xf32>
      %107 = tpu.matmul %104, %106, %cst_88 {dimension_numbers = #tpu.dot_dimension_numbers<[1], [0], [0], [1], [0, 0, 1, 1], [], []>} : vector<8x8xbf16>, vector<8x128xbf16>, vector<8x128xf32> -> vector<8x128xf32>
      %108 = arith.addf %96, %107 : vector<8x128xf32>
      %c0_89 = arith.constant 0 : index
      %c0_90 = arith.constant 0 : index
      %c0_91 = arith.constant 0 : index
      %109 = vector.load %arg7[%c0_89, %c0_90, %c0_91] : memref<1x8x128xf32, #tpu.memory_space<vmem>>, vector<1x8x128xf32>
      %110 = vector.shape_cast %109 : vector<1x8x128xf32> to vector<8x128xf32>
      %111 = vector.shape_cast %108 : vector<8x128xf32> to vector<1x8x128xf32>
      tpu.vector_store %arg7[%c0_89, %c0_90, %c0_91], %111 {strides = array<i32>} : memref<1x8x128xf32, #tpu.memory_space<vmem>>, vector<1x8x128xf32>,
    } else {
    }
    return
  }
  func.func @transform_0(%arg0: i32, %arg1: i32, %arg2: i32) -> (i32, i32, i32, i32) {
    %c0_i32 = arith.constant 0 : i32
    %c0_i32_0 = arith.constant 0 : i32
    %c0_i32_1 = arith.constant 0 : i32
    return %arg0, %c0_i32, %arg1, %c0_i32_0 : i32, i32, i32, i32
  }
  func.func @transform_1(%arg0: i32, %arg1: i32, %arg2: i32) -> (i32, i32, i32, i32) {
    %c0_i32 = arith.constant 0 : i32
    %c0_i32_0 = arith.constant 0 : i32
    %c0_i32_1 = arith.constant 0 : i32
    return %arg0, %c0_i32, %c0_i32_0, %arg2 : i32, i32, i32, i32
  }
  func.func @transform_2(%arg0: i32, %arg1: i32, %arg2: i32) -> (i32, i32, i32, i32) {
    %c0_i32 = arith.constant 0 : i32
    %c0_i32_0 = arith.constant 0 : i32
    %c0_i32_1 = arith.constant 0 : i32
    return %arg0, %c0_i32, %arg2, %c0_i32_0 : i32, i32, i32, i32
  }
  func.func @transform_3(%arg0: i32, %arg1: i32, %arg2: i32) -> (i32, i32, i32) {
    %c0_i32 = arith.constant 0 : i32
    %c0_i32_0 = arith.constant 0 : i32
    %c0_i32_1 = arith.constant 0 : i32
    %c0_i32_2 = arith.constant 0 : i32
    return %c0_i32, %c0_i32_0, %c0_i32_1 : i32, i32, i32
  }
  func.func @transform_4(%arg0: i32, %arg1: i32, %arg2: i32) -> (i32, i32, i32) {
    %c0_i32 = arith.constant 0 : i32
    %c0_i32_0 = arith.constant 0 : i32
    return %arg0, %arg1, %c0_i32 : i32, i32, i32
  }
}

</mosaic_0001>

<bundles_post_ra>
// kernel: self_attention.1
= control target key start
LH: loop header
LB: loop body
LE: loop exit
PB: predicated region body
PF: predicated region fallthrough
CT: control target
= control target key end

     0   :  { %s981_s15 = smov 0   ;;  %s983_s16 = smov 0   ;;  %s1082_s0 = inlined_call_operand.vmem [shape: bf16[2,2,8,8], index: 0, kind: input, shape index: {}]   ;;  %s1083_s1 = inlined_call_operand.vmem [shape: bf16[2,2,8,8], index: 1, kind: input, shape index: {}]   ;;  %s1084_s2 = inlined_call_operand.vmem [shape: bf16[2,2,8,8], index: 2, kind: input, shape index: {}]   ;;  %s1085_s3 = inlined_call_operand.vmem [shape: bf16[2,8,128], index: 3, kind: input, shape index: {}]   ;;  %s1086_s4 = inlined_call_operand.vmem [shape: f32[2,8,128], index: 4, kind: output, shape index: {}]  }
   0x1   :  { %s985_s17 = smov 0  }
   0x2 LB: > { %s33_s18 = sadd.s32 1, %s946_s16  ;;  %p815_p0 = scmp.ge.s32.totalorder %s950_s17, 1  ;;  %s950_s17 = sphi %s985_s17, %s14_s17   ;;  %s946_s16 = sphi %s983_s16, %s1088_s16   ;;  %s942_s15 = sphi %s981_s15, %s1087_s15  }
   0x3   : > { %p35_p1 = scmp.ge.s32.totalorder %s33_s18, 2  ;;  %p218_p2 = scmp.lt.s32.totalorder %s950_s17, 3 }
   0x5   : > { %s1090_s18 = smov (%p35_p1, %s33_s18), 0  ;;  %p219_p3 = pnand %p815_p0, %p218_p2 }
   0x6   : > { %p265_p4 = scmp.lt.s32.totalorder (!%p219_p3), %s942_s15, 1 }
   0x7   : > { %222 = sbr.rel (%p219_p3) target bundleno = 994 (0x3e2), region = 36 }
   0xc   : > { %vm306_vm0 = vcmask 64512   ;;  %v952_v0 = vmov 0.0   ;;  %vm953_vm1 = vmmov 0   ;;  %s1092_s15 = smov (!%p265_p4, %s942_s15), 1  ;;  %vm315_vm2 = vcmask 1043456  }
   0xd   : > { %850 = vmatprep.subr.bf16.mxu0 %v952_v0  ;;  %852 = vmatprep.mubr.msk.bf16.mxu0 %vm953_vm1, %v952_v0  ;;  %307 = vst.msk [vmem:[#allocation2] sm:$0xff] %vm306_vm0, %v952_v0  ;;  %308 = vst.msk [vmem:[#allocation2 + $0x8] sm:$0xff] %vm306_vm0, %v952_v0  ;;  %s1009_s19 = sshll.u32 %s1092_s15, 3  ;;  %vm301_vm3 = vcmask 7168   ;;  %v954_v7 = vmov -inf   ;;  %v955_v17 = vmov 0  }
   0xe   : > { %856 = vmatprep.subr.bf16.mxu1 %v952_v0  ;;  %858 = vmatprep.mubr.msk.bf16.mxu1 %vm953_vm1, %v952_v0  ;;  %s280_s22 = scalar_lea.vmem %s1083_s1, %s1009_s19  ;;  %s272_s25 = scalar_lea.vmem %s1082_s0, %s1009_s19  ;;  %302 = vst.msk [vmem:[#allocation3] sm:$0xff] %vm301_vm3, %v954_v7  ;;  %303 = vst.msk [vmem:[#allocation3 + $0x8] sm:$0xff] %vm301_vm3, %v954_v7  ;;  %v589_v57 = vld [vmem:[%s1085_s3] sm:$0xf]  ;;  %v830_v60 = vld [vmem:[%s1085_s3 + $0x4] sm:$0xf] }
   0xf   : > { %v310_v1 = vld [vmem:[%s280_s22] sm:$0xf]  ;;  %v826_v2 = vld [vmem:[%s280_s22 + $0x4] sm:$0xf]  ;;  %304 = vst.msk [vmem:[#allocation4] sm:$0xff] %vm301_vm3, %v952_v0  ;;  %305 = vst.msk [vmem:[#allocation4 + $0x8] sm:$0xff] %vm301_vm3, %v952_v0  ;;  %914 = vset.pattern.permute.xlu1 %v955_v17  ;;  %915 = vset.pattern.permute.xlu0 %v955_v17  ;;  %s288_s28 = scalar_lea.vmem %s1084_s2, %s1009_s19  ;;  %s295_s9 = scalar_lea.vmem %s1086_s4, %s1009_s19 }
  0x10   : > { %v317_v3 = vsel %vm315_vm2, %v310_v1, 0  ;;  %v309_v4 = vld [vmem:[%s272_s25] sm:$0xf]  ;;  %v449_v5 = vsel %vm315_vm2, %v826_v2, 0  ;;  %v825_v6 = vld [vmem:[%s272_s25 + $0x4] sm:$0xf] }
  0x11   : > { %851 = vmatpush3.bf16.msra.mxu0 %v317_v3  ;;  %v392_v27 = vld [vmem:[%s288_s28] sm:$0xf]  ;;  %v828_v35 = vld [vmem:[%s288_s28 + $0x4] sm:$0xf]  ;;  %v652_v58 = vsel %vm315_vm2, %v589_v57, 0  ;;  %v606_v61 = vsel %vm315_vm2, %v830_v60, 0 }
  0x12   : > { %862 = vmatprep.subr.bf16.mxu0 %v952_v0  ;;  %v397_v28 = vsel %vm315_vm2, %v392_v27, 0  ;;  %v532_v39 = vsel %vm315_vm2, %v828_v35, 0 }
  0x13   : > { %857 = vmatpush3.bf16.msra.mxu1 %v397_v28 }
  0x14   : > { %853 = vmatmul.mubr.msk.bf16.vlgmr.msra.gmra.mxu0 %vm306_vm0, %v309_v4  ;;  %868 = vmatprep.subr.bf16.mxu1 %v952_v0  ;;  %v384_v63 = vld [vmem:[#allocation2] sm:$0xff] }
  0x15   : > { %863 = vmatpush3.bf16.msra.mxu0 %v449_v5  ;;  %864 = vmatprep.mubr.msk.bf16.mxu0 %vm953_vm1, %v952_v0  ;;  %v359_v19 = vld [vmem:[#allocation3] sm:$0xff]  ;;  %v492_v23 = vld [vmem:[#allocation3 + $0x8] sm:$0xff]  ;;  %v518_v5 = vld [vmem:[#allocation2 + $0x8] sm:$0xff] }
  0x16   : > { %874 = vmatprep.subr.bf16.mxu0 %v952_v0  ;;  %v375_v47 = vld [vmem:[#allocation4] sm:$0xff]  ;;  %v509_v51 = vld [vmem:[#allocation4 + $0x8] sm:$0xff] }
  0x1c   : > { %865 = vmatmul.mubr.msk.bf16.vlgmr.msra.gmra.mxu0 %vm306_vm0, %v825_v6 }
  0x1d   : > { %876 = vmatprep.mubr.msk.bf16.mxu0 %vm953_vm1, %v952_v0  ;;  %875 = vmatpush3.bf16.msra.mxu0 %v606_v61 }
  0xd4   : > { %v353_v8 = vpop.f32.mrf.mxu0 }
  0xd5   : > { %v360_v9 = vsel %vm306_vm0, %v353_v8, -inf }
  0xd6   : > { %361 = vmax.xlane.f32.xlu0 %v360_v9  ;;  %v854_v10 = vpop.f32.mrf.mxu0 }
  0xd8   : > { %v356_v11 = vpop.f32.mrf.mxu0 }
  0xda   : > { %v855_v12 = vpop.f32.mrf.mxu0 }
  0xdc   : > { %v485_v13 = vpop.f32.mrf.mxu0 }
  0xdd   : > { %v493_v14 = vsel %vm306_vm0, %v485_v13, -inf }
  0xde   : > { %494 = vmax.xlane.f32.xlu0 %v493_v14  ;;  %v866_v15 = vpop.f32.mrf.mxu0 }
  0xe0   : > { %v488_v16 = vpop.f32.mrf.mxu0 }
  0xe2   : > { %v867_v18 = vpop.f32.mrf.mxu0 }
 0x15f   : > { %v362_v20 = vpop.xlane.xlu0 %361 }
 0x160   : > { %v363_v21 = vmax.f32 %v359_v19, %v362_v20 }
 0x162   : > { %v364_v22 = vsub.f32 %v359_v19, %v363_v21  ;;  %383 = vst.msk [vmem:[#allocation3] sm:$0xff] %vm301_vm3, %v363_v21  ;;  %369 = vperm.xlu1 %914, %v363_v21  }
 0x164   : > { %v365_v40 = vmul.f32 1.442695, %v364_v22 }
 0x167   : > { %v495_v24 = vpop.xlane.xlu0 %494 }
 0x168   : > { %v496_v25 = vmax.f32 %v492_v23, %v495_v24 }
 0x16a   : > { %v497_v26 = vsub.f32 %v492_v23, %v496_v25  ;;  %516 = vst.msk [vmem:[#allocation3 + $0x8] sm:$0xff] %vm301_vm3, %v496_v25  ;;  %502 = vperm.xlu1 %914, %v496_v25  }
 0x16c   : > { %v498_v42 = vmul.f32 1.442695, %v497_v26 }
 0x1dd   : > { %v370_v29 = vpop.permute.xlu1 %369 }
 0x1de   : > { %v372_v30 = vsub.f32 %v353_v8, %v370_v29 }
 0x1e0   : > { %v373_v31 = vmul.f32 1.442695, %v372_v30 }
 0x1e2   : > { %916 = vpow2.f32 %v373_v31 }
 0x1e5   : > { %v503_v32 = vpop.permute.xlu1 %502 }
 0x1e6   : > { %v505_v33 = vsub.f32 %v485_v13, %v503_v32 }
 0x1e8   : > { %v506_v34 = vmul.f32 1.442695, %v505_v33 }
 0x1ea   : > { %918 = vpow2.f32 %v506_v34 }
 0x1eb   : > { %920 = vpow2.f32 %v365_v40 }
 0x1ec   : > { %922 = vpow2.f32 %v498_v42 }
 0x1ef   : > { %v917_v36 = vpop.eup %916 }
 0x1f0   : > { %v377_v37 = vsel %vm306_vm0, %v917_v36, 0.0  ;;  %v391_v38 = vpack.c.bf16 %v917_v36, %v917_v36 }
 0x1f1   : > { %378 = vadd.xlane.f32.xlu0 %v377_v37 }
 0x1f2   : > { %859 = vmatmul.mubr.msk.bf16.vlgmr.msra.gmra.mxu1 %vm306_vm0, %v391_v38 }
 0x1f3   : > { %869 = vmatpush3.bf16.msra.mxu1 %v532_v39  ;;  %870 = vmatprep.mubr.msk.bf16.mxu1 %vm953_vm1, %v952_v0 }
 0x1f4   : > { %880 = vmatprep.subr.bf16.mxu1 %v952_v0 }
 0x1f7   : > { %v919_v41 = vpop.eup %918 }
 0x1f8   : > { %v511_v43 = vsel %vm306_vm0, %v919_v41, 0.0  ;;  %v525_v44 = vpack.c.bf16 %v919_v41, %v919_v41  ;;  %v921_v45 = vpop.eup %920 }
 0x1f9   : > { %512 = vadd.xlane.f32.xlu1 %v511_v43  ;;  %v923_v46 = vpop.eup %922  ;;  %v376_v48 = vmul.f32 %v921_v45, %v375_v47 }
 0x1fa   : > { %871 = vmatmul.mubr.msk.bf16.vlgmr.msra.gmra.mxu1 %vm306_vm0, %v525_v44  ;;  %v510_v52 = vmul.f32 %v923_v46, %v509_v51 }
 0x1fb   : > { %882 = vmatprep.mubr.msk.bf16.mxu1 %vm953_vm1, %v952_v0  ;;  %881 = vmatpush3.bf16.msra.mxu1 %v652_v58 }
 0x207   : > { %387 = vperm.xlu0 %915, %v921_v45  }
 0x20a   : > { %521 = vperm.xlu1 %914, %v923_v46  }
 0x27a   : > { %v379_v49 = vpop.xlane.xlu0 %378 }
 0x27b   : > { %v380_v50 = vadd.f32 %v379_v49, %v376_v48 }
 0x27d   : > { %382 = vst.msk [vmem:[#allocation4] sm:$0xff] %vm301_vm3, %v380_v50 }
 0x282   : > { %v513_v53 = vpop.xlane.xlu1 %512  ;;  %v388_v0 = vpop.permute.xlu0 %387 }
 0x283   : > { %v514_v54 = vadd.f32 %v513_v53, %v510_v52  ;;  %v390_v1 = vmul.f32 %v388_v0, %v384_v63 }
 0x284   : > { %v579_v55 = vld [vmem:[#allocation4] sm:$0xff] }
 0x285   : > { %515 = vst.msk [vmem:[#allocation4 + $0x8] sm:$0xff] %vm301_vm3, %v514_v54  ;;  %924 = vrcp.f32 %v579_v55 }
 0x286   : > { %v522_v6 = vpop.permute.xlu1 %521 }
 0x287   : > { %v524_v9 = vmul.f32 %v522_v6, %v518_v5 }
 0x28c   : > { %v590_v56 = vld [vmem:[#allocation4 + $0x8] sm:$0xff] }
 0x28d   : > { %926 = vrcp.f32 %v590_v56 }
 0x292   : > { %v925_v59 = vpop.eup %924 }
 0x293   : > { %584 = vperm.xlu0 %915, %v925_v59  }
 0x29a   : > { %v927_v62 = vpop.eup %926 }
 0x29b   : > { %595 = vperm.xlu0 %915, %v927_v62  }
 0x2b2   : > { %v433_v2 = vpop.f32.mrf.mxu1 }
 0x2b3   : > { %v439_v3 = vadd.f32 %v433_v2, %v390_v1 }
 0x2b4   : > { %v860_v4 = vpop.f32.mrf.mxu1 }
 0x2b5   : > { %440 = vst.msk [vmem:[#allocation2] sm:$0xff] %vm306_vm0, %v439_v3 }
 0x2b6   : > { %v436_v7 = vpop.f32.mrf.mxu1 }
 0x2b8   : > { %v861_v8 = vpop.f32.mrf.mxu1 }
 0x2ba   : > { %v568_v10 = vpop.f32.mrf.mxu1 }
 0x2bb   : > { %v574_v11 = vadd.f32 %v568_v10, %v524_v9 }
 0x2bc   : > { %v872_v12 = vpop.f32.mrf.mxu1  ;;  %v581_v15 = vld [vmem:[#allocation2] sm:$0xff] }
 0x2bd   : > { %575 = vst.msk [vmem:[#allocation2 + $0x8] sm:$0xff] %vm306_vm0, %v574_v11 }
 0x2be   : > { %v571_v13 = vpop.f32.mrf.mxu1 }
 0x2c0   : > { %v873_v14 = vpop.f32.mrf.mxu1 }
 0x2c4   : > { %v592_v19 = vld [vmem:[#allocation2 + $0x8] sm:$0xff] }
 0x30e   : > { %v585_v16 = vpop.permute.xlu0 %584 }
 0x30f   : > { %v587_v17 = vmul.f32 %v585_v16, %v581_v15 }
 0x311   : > { %v588_v18 = vpack.c.bf16 %v587_v17, %v587_v17 }
 0x313   : > { %883 = vmatmul.mubr.msk.bf16.vlgmr.msra.gmra.mxu1 %vm306_vm0, %v588_v18 }
 0x316   : > { %v596_v20 = vpop.permute.xlu0 %595 }
 0x317   : > { %v598_v21 = vmul.f32 %v596_v20, %v592_v19 }
 0x319   : > { %v599_v22 = vpack.c.bf16 %v598_v21, %v598_v21 }
 0x31b   : > { %877 = vmatmul.mubr.msk.bf16.vlgmr.msra.gmra.mxu0 %vm306_vm0, %v599_v22 }
 0x3d3   : > { %v688_v23 = vpop.f32.mrf.mxu1 }
 0x3d5   : > { %v884_v24 = vpop.f32.mrf.mxu1 }
 0x3d7   : > { %v691_v25 = vpop.f32.mrf.mxu1 }
 0x3d9   : > { %v885_v26 = vpop.f32.mrf.mxu1 }
 0x3db   : > { %v642_v27 = vpop.f32.mrf.mxu0 }
 0x3dc   : > { %v689_v28 = vadd.f32 %v688_v23, %v642_v27 }
 0x3dd   : > { %v878_v29 = vpop.f32.mrf.mxu0 }
 0x3de   : > { %694 = vst [vmem:[%s295_s9] sm:$0xff] %v689_v28 }
 0x3df   : > { %v645_v30 = vpop.f32.mrf.mxu0 }
 0x3e1   : > { %v879_v31 = vpop.f32.mrf.mxu0 }
 0x3e2 PF: > { %s14_s17 = sadd.s32 1, %s950_s17   ;;  %s1087_s15 = smov %s946_s16 }
 0x3e3   : > { %p11_p5 = scmp.ge.s32.totalorder %s14_s17, 4   ;;  %s1088_s16 = smov %s1090_s18 }
 0x3e5   :  { %13 = sbr.rel (!%p11_p5) target bundleno = 2 (0x2), region = 87 }

</bundles_post_ra>
